<compile_context>
chip_gen: v6e
topology: v6e:2x2x1
jax: 0.10.0
libtpu: 0.0.40
codegen_flags: <defaults>
</compile_context>

<pallas_src>
import jax
import jax.numpy as jnp
from jax.experimental import pallas as pl
from jax.experimental.pallas import tpu as pltpu


def _build_kernel(scales, factors, dims, store_scale, P, H, W):
    """Fused multi-scale smooth-L1 loss kernel for a static configuration."""
    n_pool = sum(1 for f in factors if f > 1)

    rb_idx, buf_idx = {}, {}
    j = 0
    for i in range(scales):
        if factors[i] > 1:
            rb_idx[i] = j
            j += 1
    j = 0
    for i in range(scales):
        if store_scale[i]:
            buf_idx[i] = j
            j += 1

    def kernel(*refs):
        t_ref = refs[0]
        x_refs = refs[1:1 + scales]
        rb_refs = refs[1 + scales:1 + scales + n_pool]
        out_refs = refs[1 + scales + n_pool:1 + scales + n_pool + 2 * scales]
        buf_refs = refs[1 + scales + n_pool + 2 * scales:]

        # 2-D (rows, cols) slab holding the previous level's target.
        src_ref = t_ref
        for i in range(scales):
            hi, wi = dims[i]
            f = factors[i]
            rows = P * hi

            if f > 1:
                # Row (sublane) pooling: f strided loads summed on the VPU.
                # Plane boundaries stay aligned because h_prev % f == 0.
                rp = src_ref[pl.ds(0, rows, stride=f), :].astype(jnp.float32)
                for r in range(1, f):
                    rp = rp + src_ref[pl.ds(r, rows, stride=f), :].astype(jnp.float32)
                # Column (lane) pooling: one batched MXU matmul.  The rb
                # matrix entries are 1/(f*f), so `pooled` is already the mean.
                pooled = jnp.dot(rp, rb_refs[rb_idx[i]][...],
                                 preferred_element_type=jnp.float32)
            else:
                # k == 1: pooling is the identity.
                pooled = src_ref[...].astype(jnp.float32)

            if store_scale[i]:
                # The next scale pools from this level via strided ref loads.
                buf_refs[buf_idx[i]][...] = pooled
                src_ref = buf_refs[buf_idx[i]]

            x = x_refs[i][...].astype(jnp.float32)          # (P*hi, wi)

            # target_valid = (target_ < 192) & (target_ > 0)
            valid = (pooled > jnp.float32(0.0)) & (pooled < jnp.float32(192.0))

            # smooth_l1 (beta = 1.0, PyTorch default)
            d = jnp.abs(x - pooled)
            sl1 = jnp.where(d < jnp.float32(1.0),
                            jnp.float32(0.5) * d * d,
                            d - jnp.float32(0.5))

            # Pre-reduce over planes + sublanes; write lane-vector partials.
            out_refs[2 * i][...] = jnp.sum(
                jnp.where(valid, sl1, jnp.float32(0.0)), axis=0, keepdims=True)
            out_refs[2 * i + 1][...] = jnp.sum(
                valid.astype(jnp.float32), axis=0, keepdims=True)

    return kernel


def multiscale_loss(inputs, target, weights=None, downscale=1, plane_block=None,
                    vmem_budget_bytes=16 * 1024 * 1024):
    """MultiScaleLoss.forward for a list/tuple of multi-scale predictions."""
    N, C, H, W = target.shape
    NC = N * C
    scales = len(inputs)

    if weights is None:
        weights = jnp.ones((scales,), jnp.float32)
    weights = jnp.asarray(weights, jnp.float32)
    assert weights.shape[0] == scales

    # Flatten (N, C, h, w) -> (N*C*h, w): metadata-only reshapes in XLA.
    t2d = target.reshape(NC * H, W)

    xs, factors, dims, rbs = [], [], [], []
    prev_h, prev_w = H, W
    for i, inp in enumerate(inputs):
        k = downscale * (2 ** i)
        hi, wi = H // k, W // k
        assert inp.shape == (N, C, hi, wi)
        f = prev_h // hi
        # AvgPool2d(k, k) with exact divisibility (as in FADNet crops).
        assert prev_h == hi * f and prev_w == wi * f, "H, W must divide the pool size"
        factors.append(f)
        dims.append((hi, wi))
        xs.append(inp.reshape(NC * hi, wi))
        if f > 1:
            col = jnp.arange(prev_w, dtype=jnp.int32)[:, None]
            out = jnp.arange(wi, dtype=jnp.int32)[None, :]
            # 1/(f*f) folded into the 0/1 pooling matrix (exact for pow-2 f).
            rbs.append(jnp.where(col // f == out,
                                 jnp.float32(1.0 / (f * f)), jnp.float32(0.0)))
        prev_h, prev_w = hi, wi

    # Scale i's pooled target must be materialized iff the next scale pools it.
    store_scale = tuple((i < scales - 1) and (downscale * 2 ** i > 1)
                        for i in range(scales))

    # ---- choose P (planes per grid step) against an explicit VMEM budget ----
    per_plane = 2 * H * W * jnp.dtype(target.dtype).itemsize  # dbl-buffered target
    for i in range(scales):
        hi, wi = dims[i]
        per_plane += 2 * hi * wi * jnp.dtype(inputs[i].dtype).itemsize  # pred blocks
        if store_scale[i]:
            per_plane += 4 * hi * wi                                    # f32 scratch
    fixed = sum(2 * int(rb.size) * 4 for rb in rbs)                     # rb operands

    if plane_block is None:
        cap = max(1, (vmem_budget_bytes - fixed) // max(1, per_plane))
        cap = int(min(cap, NC))
        divisors = [d for d in range(1, cap + 1) if NC % d == 0]
        # Prefer P keeping every block's sublane dim a multiple of 8.
        aligned = [d for d in divisors
                   if d == NC or all((d * h) % 8 == 0 for (h, _) in dims)]
        P = max(aligned) if aligned else max(divisors)
    else:
        P = int(plane_block)
        assert NC % P == 0
    NB = NC // P

    # ---- specs ----
    in_specs = [pl.BlockSpec((P * H, W), lambda b: (b, 0))]
    operands = [t2d]
    for i in range(scales):
        hi, wi = dims[i]
        in_specs.append(pl.BlockSpec((P * hi, wi), lambda b: (b, 0)))
        operands.append(xs[i])
    for rb in rbs:
        in_specs.append(pl.BlockSpec(rb.shape, lambda b: (0, 0)))
        operands.append(rb)

    out_shape, out_specs = [], []
    for i in range(scales):
        wi = dims[i][1]
        for _ in range(2):  # per-block partial sum, partial count
            out_shape.append(jax.ShapeDtypeStruct((NB, wi), jnp.float32))
            out_specs.append(pl.BlockSpec((1, wi), lambda b: (b, 0)))

    scratch_shapes = [pltpu.VMEM((P * dims[i][0], dims[i][1]), jnp.float32)
                      for i in range(scales) if store_scale[i]]

    kernel = _build_kernel(scales, tuple(factors), tuple(dims), store_scale, P, H, W)

    outs = pl.pallas_call(
        kernel,
        out_shape=tuple(out_shape),
        grid=(NB,),
        in_specs=in_specs,
        out_specs=tuple(out_specs),
        scratch_shapes=scratch_shapes,
        compiler_params=pltpu.CompilerParams(
            dimension_semantics=("parallel",),
            vmem_limit_bytes=32 * 1024 * 1024),
    )(*operands)

    total = jnp.float32(0.0)
    for i in range(scales):
        # smooth_l1_loss(..., size_average=True) over the valid selection.
        s = jnp.sum(outs[2 * i])
        c = jnp.sum(outs[2 * i + 1])
        total = total + weights[i] * (s / c)
    return total


def _reference_loss(inputs, target, weights, downscale=1):
    """Pure-JAX reference matching the PyTorch module (mask=False path)."""
    N, C, H, W = target.shape
    total = jnp.float32(0.0)
    for i, inp in enumerate(inputs):
        k = downscale * (2 ** i)
        t = target.astype(jnp.float32).reshape(
            N, C, H // k, k, W // k, k).mean(axis=(3, 5))
        valid = (t > 0.0) & (t < 192.0)
        d = jnp.abs(inp.astype(jnp.float32) - t)
        sl1 = jnp.where(d < 1.0, 0.5 * d * d, d - 0.5)
        loss = jnp.sum(jnp.where(valid, sl1, 0.0)) / jnp.sum(valid.astype(jnp.float32))
        total = total + weights[i] * loss
    return total


if __name__ == "__main__":
    key = jax.random.PRNGKey(0)
    N, C, H, W = 2, 4, 16, 16
    scales = 3
    downscale = 1

    keys = jax.random.split(key, scales + 1)
    # Disparity-like target; includes values outside (0, 192) to exercise the mask.
    target = jax.random.uniform(keys[0], (N, C, H, W), jnp.float32, -20.0, 210.0)
    inputs = [
        jax.random.uniform(
            keys[1 + i],
            (N, C, H // (downscale * 2 ** i), W // (downscale * 2 ** i)),
            jnp.float32, 0.0, 200.0)
        for i in range(scales)
    ]
    # weights=None in the module -> torch.Tensor(scales).fill_(1)
    weights = jnp.ones((scales,), jnp.float32)

    out = multiscale_loss(inputs, target, weights, downscale=downscale)
    out = jax.block_until_ready(out)

    # Also exercise the multi-block grid ("parallel" axis, per-block partials).
    out2 = multiscale_loss(inputs, target, weights, downscale=downscale, plane_block=2)
    out2 = jax.block_until_ready(out2)

    ref = _reference_loss(inputs, target, weights, downscale=downscale)
    assert jnp.isfinite(out), out
    assert jnp.allclose(out, ref, rtol=1e-4, atol=1e-5), (out, ref)
    assert jnp.allclose(out2, ref, rtol=1e-4, atol=1e-5), (out2, ref)
    print("KERNEL_OK")
</pallas_src>

<mosaic_0001>
module attributes {stable_mosaic.version = 11 : i64} {
  func.func @kernel(%arg0: i32, %arg1: memref<128x16xf32, #tpu.memory_space<vmem>>, %arg2: memref<128x16xf32, #tpu.memory_space<vmem>>, %arg3: memref<64x8xf32, #tpu.memory_space<vmem>>, %arg4: memref<32x4xf32, #tpu.memory_space<vmem>>, %arg5: memref<16x8xf32, #tpu.memory_space<vmem>>, %arg6: memref<8x4xf32, #tpu.memory_space<vmem>>, %arg7: memref<1x16xf32, #tpu.memory_space<vmem>>, %arg8: memref<1x16xf32, #tpu.memory_space<vmem>>, %arg9: memref<1x8xf32, #tpu.memory_space<vmem>>, %arg10: memref<1x8xf32, #tpu.memory_space<vmem>>, %arg11: memref<1x4xf32, #tpu.memory_space<vmem>>, %arg12: memref<1x4xf32, #tpu.memory_space<vmem>>, %arg13: memref<64x8xf32, #tpu.memory_space<vmem>>) attributes {dimension_semantics = [#tpu.dimension_semantics<parallel>], iteration_bounds = array<i64: 1>, scalar_prefetch = 0 : i64, scratch_operands = 1 : i64, tpu.core_type = #tpu.core_type<tc>, window_params = [{transform_indices = @transform_0, window_bounds = array<i64: 128, 16>}, {transform_indices = @transform_1, window_bounds = array<i64: 128, 16>}, {transform_indices = @transform_2, window_bounds = array<i64: 64, 8>}, {transform_indices = @transform_3, window_bounds = array<i64: 32, 4>}, {pipeline_mode = #tpu.pipeline_mode<synchronous>, transform_indices = @transform_4, window_bounds = array<i64: 16, 8>}, {pipeline_mode = #tpu.pipeline_mode<synchronous>, transform_indices = @transform_5, window_bounds = array<i64: 8, 4>}, {transform_indices = @transform_6, window_bounds = array<i64: 1, 16>}, {transform_indices = @transform_7, window_bounds = array<i64: 1, 16>}, {transform_indices = @transform_8, window_bounds = array<i64: 1, 8>}, {transform_indices = @transform_9, window_bounds = array<i64: 1, 8>}, {transform_indices = @transform_10, window_bounds = array<i64: 1, 4>}, {transform_indices = @transform_11, window_bounds = array<i64: 1, 4>}]} {
    %c0 = arith.constant 0 : index
    %c0_0 = arith.constant 0 : index
    %0 = vector.load %arg1[%c0, %c0_0] : memref<128x16xf32, #tpu.memory_space<vmem>>, vector<128x16xf32>
    %c0_1 = arith.constant 0 : index
    %c0_2 = arith.constant 0 : index
    %1 = vector.load %arg2[%c0_1, %c0_2] : memref<128x16xf32, #tpu.memory_space<vmem>>, vector<128x16xf32>
    %cst = arith.constant 0.000000e+00 : f32
    %2 = vector.broadcast %cst : f32 to vector<128x16xf32>
    %3 = arith.cmpf ogt, %0, %2 : vector<128x16xf32>
    %cst_3 = arith.constant 1.920000e+02 : f32
    %4 = vector.broadcast %cst_3 : f32 to vector<128x16xf32>
    %5 = arith.cmpf olt, %0, %4 : vector<128x16xf32>
    %6 = arith.andi %3, %5 : vector<128x16xi1>
    %7 = arith.subf %1, %0 : vector<128x16xf32>
    %8 = math.absf %7 : vector<128x16xf32>
    %cst_4 = arith.constant 1.000000e+00 : f32
    %9 = vector.broadcast %cst_4 : f32 to vector<128x16xf32>
    %10 = arith.cmpf olt, %8, %9 : vector<128x16xf32>
    %cst_5 = arith.constant 5.000000e-01 : f32
    %11 = vector.broadcast %cst_5 : f32 to vector<128x16xf32>
    %12 = arith.mulf %11, %8 : vector<128x16xf32>
    %13 = arith.mulf %12, %8 : vector<128x16xf32>
    %cst_6 = arith.constant 5.000000e-01 : f32
    %14 = vector.broadcast %cst_6 : f32 to vector<128x16xf32>
    %15 = arith.subf %8, %14 : vector<128x16xf32>
    %16 = arith.select %10, %13, %15 : vector<128x16xi1>, vector<128x16xf32>
    %cst_7 = arith.constant 0.000000e+00 : f32
    %17 = vector.broadcast %cst_7 : f32 to vector<128x16xf32>
    %18 = arith.select %6, %16, %17 : vector<128x16xi1>, vector<128x16xf32>
    %cst_8 = arith.constant dense<0.000000e+00> : vector<16xf32>
    %19 = vector.multi_reduction <add>, %18, %cst_8 [0] : vector<128x16xf32> to vector<16xf32>
    %20 = vector.shape_cast %19 : vector<16xf32> to vector<1x16xf32>
    %c0_9 = arith.constant 0 : index
    %c0_10 = arith.constant 0 : index
    %21 = vector.load %arg7[%c0_9, %c0_10] : memref<1x16xf32, #tpu.memory_space<vmem>>, vector<1x16xf32>
    tpu.vector_store %arg7[%c0_9, %c0_10], %20 {strides = array<i32>} : memref<1x16xf32, #tpu.memory_space<vmem>>, vector<1x16xf32>,
    %22 = arith.extui %6 : vector<128x16xi1> to vector<128x16xi32>
    %23 = arith.sitofp %22 : vector<128x16xi32> to vector<128x16xf32>
    %cst_11 = arith.constant dense<0.000000e+00> : vector<16xf32>
    %24 = vector.multi_reduction <add>, %23, %cst_11 [0] : vector<128x16xf32> to vector<16xf32>
    %25 = vector.shape_cast %24 : vector<16xf32> to vector<1x16xf32>
    %c0_12 = arith.constant 0 : index
    %c0_13 = arith.constant 0 : index
    %26 = vector.load %arg8[%c0_12, %c0_13] : memref<1x16xf32, #tpu.memory_space<vmem>>, vector<1x16xf32>
    tpu.vector_store %arg8[%c0_12, %c0_13], %25 {strides = array<i32>} : memref<1x16xf32, #tpu.memory_space<vmem>>, vector<1x16xf32>,
    %c0_14 = arith.constant 0 : index
    %c0_15 = arith.constant 0 : index
    %27 = tpu.strided_load %arg1[%c0_14, %c0_15] {strides = array<i32: 2, 1>} : memref<128x16xf32, #tpu.memory_space<vmem>>, vector<64x16xf32>
    %c1 = arith.constant 1 : index
    %c0_16 = arith.constant 0 : index
    %28 = tpu.strided_load %arg1[%c1, %c0_16] {strides = array<i32: 2, 1>} : memref<128x16xf32, #tpu.memory_space<vmem>>, vector<64x16xf32>
    %29 = arith.addf %27, %28 : vector<64x16xf32>
    %c0_17 = arith.constant 0 : index
    %c0_18 = arith.constant 0 : index
    %30 = vector.load %arg5[%c0_17, %c0_18] : memref<16x8xf32, #tpu.memory_space<vmem>>, vector<16x8xf32>
    %cst_19 = arith.constant dense<0.000000e+00> : vector<64x8xf32>
    %31 = tpu.matmul %29, %30, %cst_19 {dimension_numbers = #tpu.dot_dimension_numbers<[1], [0], [0], [1], [0, 0, 1, 1], [], []>} : vector<64x16xf32>, vector<16x8xf32>, vector<64x8xf32> -> vector<64x8xf32>
    %c0_20 = arith.constant 0 : index
    %c0_21 = arith.constant 0 : index
    %32 = vector.load %arg13[%c0_20, %c0_21] : memref<64x8xf32, #tpu.memory_space<vmem>>, vector<64x8xf32>
    tpu.vector_store %arg13[%c0_20, %c0_21], %31 {strides = array<i32>} : memref<64x8xf32, #tpu.memory_space<vmem>>, vector<64x8xf32>,
    %c0_22 = arith.constant 0 : index
    %c0_23 = arith.constant 0 : index
    %33 = vector.load %arg3[%c0_22, %c0_23] : memref<64x8xf32, #tpu.memory_space<vmem>>, vector<64x8xf32>
    %cst_24 = arith.constant 0.000000e+00 : f32
    %34 = vector.broadcast %cst_24 : f32 to vector<64x8xf32>
    %35 = arith.cmpf ogt, %31, %34 : vector<64x8xf32>
    %cst_25 = arith.constant 1.920000e+02 : f32
    %36 = vector.broadcast %cst_25 : f32 to vector<64x8xf32>
    %37 = arith.cmpf olt, %31, %36 : vector<64x8xf32>
    %38 = arith.andi %35, %37 : vector<64x8xi1>
    %39 = arith.subf %33, %31 : vector<64x8xf32>
    %40 = math.absf %39 : vector<64x8xf32>
    %cst_26 = arith.constant 1.000000e+00 : f32
    %41 = vector.broadcast %cst_26 : f32 to vector<64x8xf32>
    %42 = arith.cmpf olt, %40, %41 : vector<64x8xf32>
    %cst_27 = arith.constant 5.000000e-01 : f32
    %43 = vector.broadcast %cst_27 : f32 to vector<64x8xf32>
    %44 = arith.mulf %43, %40 : vector<64x8xf32>
    %45 = arith.mulf %44, %40 : vector<64x8xf32>
    %cst_28 = arith.constant 5.000000e-01 : f32
    %46 = vector.broadcast %cst_28 : f32 to vector<64x8xf32>
    %47 = arith.subf %40, %46 : vector<64x8xf32>
    %48 = arith.select %42, %45, %47 : vector<64x8xi1>, vector<64x8xf32>
    %cst_29 = arith.constant 0.000000e+00 : f32
    %49 = vector.broadcast %cst_29 : f32 to vector<64x8xf32>
    %50 = arith.select %38, %48, %49 : vector<64x8xi1>, vector<64x8xf32>
    %cst_30 = arith.constant dense<0.000000e+00> : vector<8xf32>
    %51 = vector.multi_reduction <add>, %50, %cst_30 [0] : vector<64x8xf32> to vector<8xf32>
    %52 = vector.shape_cast %51 : vector<8xf32> to vector<1x8xf32>
    %c0_31 = arith.constant 0 : index
    %c0_32 = arith.constant 0 : index
    %53 = vector.load %arg9[%c0_31, %c0_32] : memref<1x8xf32, #tpu.memory_space<vmem>>, vector<1x8xf32>
    tpu.vector_store %arg9[%c0_31, %c0_32], %52 {strides = array<i32>} : memref<1x8xf32, #tpu.memory_space<vmem>>, vector<1x8xf32>,
    %54 = arith.extui %38 : vector<64x8xi1> to vector<64x8xi32>
    %55 = arith.sitofp %54 : vector<64x8xi32> to vector<64x8xf32>
    %cst_33 = arith.constant dense<0.000000e+00> : vector<8xf32>
    %56 = vector.multi_reduction <add>, %55, %cst_33 [0] : vector<64x8xf32> to vector<8xf32>
    %57 = vector.shape_cast %56 : vector<8xf32> to vector<1x8xf32>
    %c0_34 = arith.constant 0 : index
    %c0_35 = arith.constant 0 : index
    %58 = vector.load %arg10[%c0_34, %c0_35] : memref<1x8xf32, #tpu.memory_space<vmem>>, vector<1x8xf32>
    tpu.vector_store %arg10[%c0_34, %c0_35], %57 {strides = array<i32>} : memref<1x8xf32, #tpu.memory_space<vmem>>, vector<1x8xf32>,
    %c0_36 = arith.constant 0 : index
    %c0_37 = arith.constant 0 : index
    %59 = tpu.strided_load %arg13[%c0_36, %c0_37] {strides = array<i32: 2, 1>} : memref<64x8xf32, #tpu.memory_space<vmem>>, vector<32x8xf32>
    %c1_38 = arith.constant 1 : index
    %c0_39 = arith.constant 0 : index
    %60 = tpu.strided_load %arg13[%c1_38, %c0_39] {strides = array<i32: 2, 1>} : memref<64x8xf32, #tpu.memory_space<vmem>>, vector<32x8xf32>
    %61 = arith.addf %59, %60 : vector<32x8xf32>
    %c0_40 = arith.constant 0 : index
    %c0_41 = arith.constant 0 : index
    %62 = vector.load %arg6[%c0_40, %c0_41] : memref<8x4xf32, #tpu.memory_space<vmem>>, vector<8x4xf32>
    %cst_42 = arith.constant dense<0.000000e+00> : vector<32x4xf32>
    %63 = tpu.matmul %61, %62, %cst_42 {dimension_numbers = #tpu.dot_dimension_numbers<[1], [0], [0], [1], [0, 0, 1, 1], [], []>} : vector<32x8xf32>, vector<8x4xf32>, vector<32x4xf32> -> vector<32x4xf32>
    %c0_43 = arith.constant 0 : index
    %c0_44 = arith.constant 0 : index
    %64 = vector.load %arg4[%c0_43, %c0_44] : memref<32x4xf32, #tpu.memory_space<vmem>>, vector<32x4xf32>
    %cst_45 = arith.constant 0.000000e+00 : f32
    %65 = vector.broadcast %cst_45 : f32 to vector<32x4xf32>
    %66 = arith.cmpf ogt, %63, %65 : vector<32x4xf32>
    %cst_46 = arith.constant 1.920000e+02 : f32
    %67 = vector.broadcast %cst_46 : f32 to vector<32x4xf32>
    %68 = arith.cmpf olt, %63, %67 : vector<32x4xf32>
    %69 = arith.andi %66, %68 : vector<32x4xi1>
    %70 = arith.subf %64, %63 : vector<32x4xf32>
    %71 = math.absf %70 : vector<32x4xf32>
    %cst_47 = arith.constant 1.000000e+00 : f32
    %72 = vector.broadcast %cst_47 : f32 to vector<32x4xf32>
    %73 = arith.cmpf olt, %71, %72 : vector<32x4xf32>
    %cst_48 = arith.constant 5.000000e-01 : f32
    %74 = vector.broadcast %cst_48 : f32 to vector<32x4xf32>
    %75 = arith.mulf %74, %71 : vector<32x4xf32>
    %76 = arith.mulf %75, %71 : vector<32x4xf32>
    %cst_49 = arith.constant 5.000000e-01 : f32
    %77 = vector.broadcast %cst_49 : f32 to vector<32x4xf32>
    %78 = arith.subf %71, %77 : vector<32x4xf32>
    %79 = arith.select %73, %76, %78 : vector<32x4xi1>, vector<32x4xf32>
    %cst_50 = arith.constant 0.000000e+00 : f32
    %80 = vector.broadcast %cst_50 : f32 to vector<32x4xf32>
    %81 = arith.select %69, %79, %80 : vector<32x4xi1>, vector<32x4xf32>
    %cst_51 = arith.constant dense<0.000000e+00> : vector<4xf32>
    %82 = vector.multi_reduction <add>, %81, %cst_51 [0] : vector<32x4xf32> to vector<4xf32>
    %83 = vector.shape_cast %82 : vector<4xf32> to vector<1x4xf32>
    %c0_52 = arith.constant 0 : index
    %c0_53 = arith.constant 0 : index
    %84 = vector.load %arg11[%c0_52, %c0_53] : memref<1x4xf32, #tpu.memory_space<vmem>>, vector<1x4xf32>
    tpu.vector_store %arg11[%c0_52, %c0_53], %83 {strides = array<i32>} : memref<1x4xf32, #tpu.memory_space<vmem>>, vector<1x4xf32>,
    %85 = arith.extui %69 : vector<32x4xi1> to vector<32x4xi32>
    %86 = arith.sitofp %85 : vector<32x4xi32> to vector<32x4xf32>
    %cst_54 = arith.constant dense<0.000000e+00> : vector<4xf32>
    %87 = vector.multi_reduction <add>, %86, %cst_54 [0] : vector<32x4xf32> to vector<4xf32>
    %88 = vector.shape_cast %87 : vector<4xf32> to vector<1x4xf32>
    %c0_55 = arith.constant 0 : index
    %c0_56 = arith.constant 0 : index
    %89 = vector.load %arg12[%c0_55, %c0_56] : memref<1x4xf32, #tpu.memory_space<vmem>>, vector<1x4xf32>
    tpu.vector_store %arg12[%c0_55, %c0_56], %88 {strides = array<i32>} : memref<1x4xf32, #tpu.memory_space<vmem>>, vector<1x4xf32>,
    return
  }
  func.func @transform_0(%arg0: i32) -> (i32, i32) {
    %c0_i32 = arith.constant 0 : i32
    %c0_i32_0 = arith.constant 0 : i32
    return %arg0, %c0_i32 : i32, i32
  }
  func.func @transform_1(%arg0: i32) -> (i32, i32) {
    %c0_i32 = arith.constant 0 : i32
    %c0_i32_0 = arith.constant 0 : i32
    return %arg0, %c0_i32 : i32, i32
  }
  func.func @transform_2(%arg0: i32) -> (i32, i32) {
    %c0_i32 = arith.constant 0 : i32
    %c0_i32_0 = arith.constant 0 : i32
    return %arg0, %c0_i32 : i32, i32
  }
  func.func @transform_3(%arg0: i32) -> (i32, i32) {
    %c0_i32 = arith.constant 0 : i32
    %c0_i32_0 = arith.constant 0 : i32
    return %arg0, %c0_i32 : i32, i32
  }
  func.func @transform_4(%arg0: i32) -> (i32, i32) {
    %c0_i32 = arith.constant 0 : i32
    %c0_i32_0 = arith.constant 0 : i32
    %c0_i32_1 = arith.constant 0 : i32
    return %c0_i32, %c0_i32_0 : i32, i32
  }
  func.func @transform_5(%arg0: i32) -> (i32, i32) {
    %c0_i32 = arith.constant 0 : i32
    %c0_i32_0 = arith.constant 0 : i32
    %c0_i32_1 = arith.constant 0 : i32
    return %c0_i32, %c0_i32_0 : i32, i32
  }
  func.func @transform_6(%arg0: i32) -> (i32, i32) {
    %c0_i32 = arith.constant 0 : i32
    %c0_i32_0 = arith.constant 0 : i32
    return %arg0, %c0_i32 : i32, i32
  }
  func.func @transform_7(%arg0: i32) -> (i32, i32) {
    %c0_i32 = arith.constant 0 : i32
    %c0_i32_0 = arith.constant 0 : i32
    return %arg0, %c0_i32 : i32, i32
  }
  func.func @transform_8(%arg0: i32) -> (i32, i32) {
    %c0_i32 = arith.constant 0 : i32
    %c0_i32_0 = arith.constant 0 : i32
    return %arg0, %c0_i32 : i32, i32
  }
  func.func @transform_9(%arg0: i32) -> (i32, i32) {
    %c0_i32 = arith.constant 0 : i32
    %c0_i32_0 = arith.constant 0 : i32
    return %arg0, %c0_i32 : i32, i32
  }
  func.func @transform_10(%arg0: i32) -> (i32, i32) {
    %c0_i32 = arith.constant 0 : i32
    %c0_i32_0 = arith.constant 0 : i32
    return %arg0, %c0_i32 : i32, i32
  }
  func.func @transform_11(%arg0: i32) -> (i32, i32) {
    %c0_i32 = arith.constant 0 : i32
    %c0_i32_0 = arith.constant 0 : i32
    return %arg0, %c0_i32 : i32, i32
  }
}

</mosaic_0001>

<bundles_post_ra>
// kernel: tpu_custom_call.1
= control target key start
LH: loop header
LB: loop body
LE: loop exit
PB: predicated region body
PF: predicated region fallthrough
CT: control target
= control target key end

     0   :  { %17 = vsyncpa [#allocation4], 0  ;;  %s2079_s0 = inlined_call_operand.vmem [shape: f32[128,16], index: 0, kind: input, shape index: {}]   ;;  %s2080_s1 = inlined_call_operand.vmem [shape: f32[128,16], index: 1, kind: input, shape index: {}]   ;;  %s2081_s2 = inlined_call_operand.vmem [shape: f32[64,8], index: 2, kind: input, shape index: {}]   ;;  %s2082_s3 = inlined_call_operand.vmem [shape: f32[32,4], index: 3, kind: input, shape index: {}]   ;;  %s2083_s4 = inlined_call_operand.vmem [shape: f32[16,8], index: 4, kind: input, shape index: {}]   ;;  %s2084_s5 = inlined_call_operand.vmem [shape: f32[8,4], index: 5, kind: input, shape index: {}]   ;;  %s2085_s6 = inlined_call_operand.hbm [shape: f32[1,16], index: 6, kind: output, shape index: {0}]   ;;  %s2086_s7 = inlined_call_operand.hbm [shape: f32[1,16], index: 7, kind: output, shape index: {1}]   ;;  %s2087_s8 = inlined_call_operand.hbm [shape: f32[1,8], index: 8, kind: output, shape index: {2}]   ;;  %s2088_s9 = inlined_call_operand.hbm [shape: f32[1,8], index: 9, kind: output, shape index: {3}]   ;;  %s2089_s10 = inlined_call_operand.hbm [shape: f32[1,4], index: 10, kind: output, shape index: {4}]   ;;  %s2090_s11 = inlined_call_operand.hbm [shape: f32[1,4], index: 11, kind: output, shape index: {5}]  }
   0x1   :  { %18 = vsyncpa [#allocation6], 0 }
   0x2   :  { %19 = vsyncpa [#allocation9], 0  ;;  %v391_v0 = vld [vmem:[%s2083_s4 + $0x8] sm:$0xff]  ;;  %v390_v1 = vld [vmem:[%s2083_s4] sm:$0xff]  ;;  %vm2094_vm0 = vcmask 130048  }
   0x3   :  { %v351_v2 = vld [vmem:[%s2079_s0] ss:$2 sm:$0xff]  ;;  %1070 = vmatprep.subr.mxu0 %v391_v0  ;;  %1094 = vmatprep.subr.mxu1 %v391_v0  ;;  %v1011_v3 = vld [vmem:[%s2079_s0 + $0x1] ss:$2 sm:$0xff]  ;;  %v1004_v8 = vld [vmem:[%s2079_s0 + $0x10] ss:$2 sm:$0xff] }
   0x4   :  { %v1009_v4 = vld [vmem:[%s2079_s0 + $0x60] ss:$2 sm:$0xff]  ;;  %v1017_v5 = vld [vmem:[%s2079_s0 + $0x61] ss:$2 sm:$0xff]  ;;  %1071 = vmatpush3.msra.mxu0 %v391_v0  ;;  %1096 = vmatpush3.msra.mxu1 %v391_v0  ;;  %v382_v6 = vadd.f32 %v1011_v3, %v351_v2  ;;  %v1012_v9 = vld [vmem:[%s2079_s0 + $0x11] ss:$2 sm:$0xff] }
   0x5   :  { %v388_v7 = vadd.f32 %v1017_v5, %v1009_v4  ;;  %v1010_v10 = vld [vmem:[%s2079_s0 + $0x70] ss:$2 sm:$0xff]  ;;  %1072 = vmatprep.subr.mxu0 %v390_v1  ;;  %1095 = vmatprep.subr.mxu1 %v390_v1  ;;  %v383_v11 = vadd.f32 %v1012_v9, %v1004_v8  ;;  %v1018_v12 = vld [vmem:[%s2079_s0 + $0x71] ss:$2 sm:$0xff]  ;;  %v1005_v13 = vld [vmem:[%s2079_s0 + $0x20] ss:$2 sm:$0xff] }
   0x6   :  { %v1013_v14 = vld [vmem:[%s2079_s0 + $0x21] ss:$2 sm:$0xff]  ;;  %1073 = vmatpush3.msra.mxu0 %v390_v1  ;;  %1097 = vmatpush3.msra.mxu1 %v390_v1  ;;  %v389_v15 = vadd.f32 %v1018_v12, %v1010_v10  ;;  %v1006_v17 = vld [vmem:[%s2079_s0 + $0x30] ss:$2 sm:$0xff]  ;;  %v1014_v18 = vld [vmem:[%s2079_s0 + $0x31] ss:$2 sm:$0xff] }
   0x7   :  { %v384_v16 = vadd.f32 %v1013_v14, %v1005_v13  ;;  %v1007_v19 = vld [vmem:[%s2079_s0 + $0x40] ss:$2 sm:$0xff]  ;;  %1074 = vmatprep.mubr.msk.f32.mxu0 %vm2094_vm0, %v382_v6  ;;  %1083 = vmatprep.mubr.msk.f32.mxu1 %vm2094_vm0, %v388_v7  ;;  %v1015_v20 = vld [vmem:[%s2079_s0 + $0x41] ss:$2 sm:$0xff]  ;;  %v385_v21 = vadd.f32 %v1014_v18, %v1006_v17 }
   0x8   :  { %1075 = vmatmul.mubr.msk.f32.vlgmr.msra.gmra.mxu0 %vm2094_vm0, %v383_v11  ;;  %1084 = vmatmul.mubr.msk.f32.vlgmr.msra.gmra.mxu1 %vm2094_vm0, %v389_v15 }
   0x9   :  { %20 = vsyncpa [#allocation12], 0  ;;  %1077 = vmatprep.mubr.msk.f32.mxu0 %vm2094_vm0, %v384_v16  ;;  %v386_v22 = vadd.f32 %v1015_v20, %v1007_v19  ;;  %v1008_v23 = vld [vmem:[%s2079_s0 + $0x50] ss:$2 sm:$0xff]  ;;  %v1016_v24 = vld [vmem:[%s2079_s0 + $0x51] ss:$2 sm:$0xff] }
   0xa   :  { %v387_v25 = vadd.f32 %v1016_v24, %v1008_v23  ;;  %v706_v26 = vld [vmem:[%s2084_s5] sm:$0xff]  ;;  %vm521_vm1 = vcmask 64512   ;;  %v531_v27 = vld [vmem:[%s2081_s2 + $0x8] sm:$0xff]  ;;  %v537_v28 = vld [vmem:[%s2081_s2 + $0x38] sm:$0xff]  ;;  %v1233_v49 = vmov 0.0   ;;  %s1234_s16 = smov [#allocation8]  }
   0xb   :  { %1086 = vmatprep.subr.mxu1 %v706_v26  ;;  %v530_v32 = vld [vmem:[%s2081_s2] sm:$0xff]  ;;  %v536_v43 = vld [vmem:[%s2081_s2 + $0x30] sm:$0xff]  ;;  %v533_v61 = vld [vmem:[%s2081_s2 + $0x18] sm:$0xff]  ;;  %s926_s17 = sshll.u32 %s1234_s16, 4  ;;  %s927_s17 = int_to_ptr.vmem [resolvable:$true] %s926_s17 }
   0xc   :  { %1078 = vmatmul.mubr.msk.f32.gmra.mxu0 %vm2094_vm0, %v385_v21  ;;  %1087 = vmatpush3.msra.mxu1 %v706_v26  ;;  %v532_v5 = vld [vmem:[%s2081_s2 + $0x10] sm:$0xff]  ;;  %v535_v9 = vld [vmem:[%s2081_s2 + $0x28] sm:$0xff]  ;;  %s1105_s21 = scalar_lea.vmem %s927_s17, 16  ;;  %s1109_s22 = scalar_lea.vmem %s927_s17, 32 }
   0xd   :  { %1080 = vmatprep.mubr.msk.f32.mxu0 %vm2094_vm0, %v386_v22  ;;  %p1106_p0 = scmp.ne.s32.totalorder %s927_s17, %s1105_s21  ;;  %p1110_p1 = scmp.lt.s32.totalorder %s927_s17, %s927_s17 }
   0xe   :  { %p1111_p2 = scmp.lt.s32.totalorder %s1109_s22, %s1105_s21 }
  0x10   :  { %1081 = vmatmul.mubr.msk.f32.gmra.mxu0 %vm2094_vm0, %v387_v25  ;;  %p1112_p3 = por %p1111_p2, %p1110_p1 }
  0x12   :  { %p1113_p4 = pnand %p1112_p3, %p1106_p0 }
  0xc8   :  { %v1076_v29 = vpop.f32.mrf.mxu0  ;;  %v1085_v30 = vpop.f32.mrf.mxu1 }
  0xc9   :  { %523 = vst.msk [vmem:[#allocation2 + $0x8] sm:$0xff] %vm521_vm1, %v1076_v29  ;;  %v563_v31 = vsub.f32 %v531_v27, %v1076_v29  ;;  %529 = vst.msk [vmem:[#allocation2 + $0x38] sm:$0xff] %vm521_vm1, %v1085_v30  ;;  %v569_v33 = vsub.f32 %v537_v28, %v1085_v30  ;;  %vm539_vm4 = vcmp.gt.f32.partialorder %v1076_v29, 0.0  ;;  %vm547_vm5 = vcmp.lt.f32.partialorder %v1076_v29, 192.0 }
  0xca   :  { %v482_v34 = vpop.f32.mrf.mxu0  ;;  %v512_v35 = vpop.f32.mrf.mxu1  ;;  %vm1388_vm7 = vmand %vm539_vm4, %vm547_vm5  ;;  %vm545_vm8 = vcmp.gt.f32.partialorder %v1085_v30, 0.0  ;;  %vm553_vm9 = vcmp.lt.f32.partialorder %v1085_v30, 192.0 }
  0xcb   :  { %v571_v36 = vand.u32 2147483647, %v563_v31  ;;  %522 = vst.msk [vmem:[#allocation2] sm:$0xff] %vm521_vm1, %v482_v34  ;;  %vm538_vm2 = vcmp.gt.f32.partialorder %v482_v34, 0.0  ;;  %vm546_vm3 = vcmp.lt.f32.partialorder %v482_v34, 192.0  ;;  %528 = vst.msk [vmem:[#allocation2 + $0x30] sm:$0xff] %vm521_vm1, %v512_v35  ;;  %v562_v37 = vsub.f32 %v530_v32, %v482_v34 }
  0xcc   :  { %v1079_v38 = vpop.f32.mrf.mxu0  ;;  %vm1378_vm6 = vmand %vm538_vm2, %vm546_vm3  ;;  %v1383_v41 = vand.u32 2147483647, %v569_v33  ;;  %vm544_vm11 = vcmp.gt.f32.partialorder %v512_v35, 0.0  ;;  %vm552_vm12 = vcmp.lt.f32.partialorder %v512_v35, 192.0  ;;  %v568_v53 = vsub.f32 %v536_v43, %v512_v35  ;;  %v534_v32 = vld [vmem:[%s2081_s2 + $0x20] sm:$0xff] }
  0xcd   :  { %v587_v39 = vmul.f32 0.5, %v571_v36  ;;  %525 = vst.msk [vmem:[#allocation2 + $0x18] sm:$0xff] %vm521_vm1, %v1079_v38  ;;  %v570_v42 = vand.u32 2147483647, %v562_v37  ;;  %v1028_v47 = vadd.f32 -0.5, %v571_v36  ;;  %vm579_vm10 = vcmp.lt.f32.partialorder %v571_v36, 1.0  ;;  %vm1400_vm13 = vmand %vm545_vm8, %vm553_vm9 }
  0xce   :  { %v492_v44 = vpop.f32.mrf.mxu0  ;;  %v1035_v50 = vsel %vm1378_vm6, 1.0, %v1233_v49  ;;  %v1036_v54 = vsel %vm1388_vm7, 1.0, %v1233_v49  ;;  %v593_v56 = vmul.f32 0.5, %v1383_v41  ;;  %vm1417_vm15 = vmand %vm544_vm11, %vm552_vm12  ;;  %vm541_vm2 = vcmp.gt.f32.partialorder %v1079_v38, 0.0 }
  0xcf   :  { %v595_v46 = vmul.f32 %v587_v39, %v571_v36  ;;  %524 = vst.msk [vmem:[#allocation2 + $0x10] sm:$0xff] %vm521_vm1, %v492_v44  ;;  %v586_v48 = vmul.f32 0.5, %v570_v42  ;;  %v1027_v58 = vadd.f32 -0.5, %v570_v42  ;;  %vm578_vm14 = vcmp.lt.f32.partialorder %v570_v42, 1.0 }
  0xd0   :  { %v1082_v51 = vpop.f32.mrf.mxu0  ;;  %v665_v60 = vsel %vm521_vm1, %v1035_v50, 0.0  ;;  %vm549_vm3 = vcmp.lt.f32.partialorder %v1079_v38, 192.0  ;;  %v666_v1 = vsel %vm521_vm1, %v1036_v54, 0.0  ;;  %v1423_v2 = vadd.f32 -0.5, %v1383_v41 }
  0xd1   :  { %v611_v52 = vsel %vm579_vm10, %v595_v46, %v1028_v47  ;;  %527 = vst.msk [vmem:[#allocation2 + $0x28] sm:$0xff] %vm521_vm1, %v1082_v51  ;;  %v594_v57 = vmul.f32 %v586_v48, %v570_v42  ;;  %v1428_v3 = vsel %vm1400_vm13, 1.0, %v1233_v49  ;;  %v1430_v4 = vand.u32 2147483647, %v568_v53  ;;  %vm1448_vm5 = vmand %vm541_vm2, %vm549_vm3 }
  0xd2   :  { %v1405_v59 = vpop.f32.mrf.mxu0  ;;  %v619_v62 = vsel %vm1388_vm7, %v611_v52, 0.0  ;;  %v1436_v6 = vmul.f32 %v593_v56, %v1383_v41  ;;  %v565_v8 = vsub.f32 %v533_v61, %v1079_v38  ;;  %vm540_vm4 = vcmp.gt.f32.partialorder %v492_v44, 0.0  ;;  %v687_v33 = vld [vmem:[#allocation2] ss:$2 sm:$0xff]  ;;  %v695_v34 = vld [vmem:[#allocation2 + $0x1] ss:$2 sm:$0xff] }
  0xd3   :  { %526 = vst.msk [vmem:[#allocation2 + $0x20] sm:$0xff] %vm521_vm1, %v1405_v59  ;;  %v610_v63 = vsel %vm578_vm14, %v594_v57, %v1027_v58  ;;  %v627_v10 = vsel %vm521_vm1, %v619_v62, 0.0  ;;  %v667_v11 = vadd.f32 %v666_v1, %v665_v60  ;;  %v1041_v12 = vsel %vm1417_vm15, 1.0, %v1233_v49 }
  0xd4   :  { %v618_v7 = vsel %vm1378_vm6, %v610_v63, 0.0  ;;  %vm548_vm7 = vcmp.lt.f32.partialorder %v492_v44, 192.0  ;;  %v573_v14 = vand.u32 2147483647, %v565_v8  ;;  %v564_v16 = vsub.f32 %v532_v5, %v492_v44  ;;  %v693_v5 = vld [vmem:[#allocation2 + $0x30] ss:$2 sm:$0xff] }
  0xd5   :  { %vm1452_vm6 = vmand %vm540_vm4, %vm548_vm7  ;;  %vm543_vm8 = vcmp.gt.f32.partialorder %v1082_v51, 0.0  ;;  %vm551_vm9 = vcmp.lt.f32.partialorder %v1082_v51, 192.0  ;;  %v626_v17 = vsel %vm521_vm1, %v618_v7, 0.0  ;;  %v592_v18 = vmul.f32 0.5, %v1430_v4 }
  0xd6   :  { %v1037_v19 = vsel %vm1452_vm6, 1.0, %v1233_v49  ;;  %v567_v20 = vsub.f32 %v535_v9, %v1082_v51  ;;  %v1462_v21 = vsel %vm521_vm1, %v1041_v12, 0.0  ;;  %v589_v22 = vmul.f32 0.5, %v573_v14  ;;  %vm1472_vm11 = vmand %vm543_vm8, %vm551_vm9  ;;  %v689_v40 = vld [vmem:[#allocation2 + $0x10] ss:$2 sm:$0xff] }
  0xd7   :  { %v1038_v23 = vsel %vm1448_vm5, 1.0, %v1233_v49  ;;  %vm542_vm10 = vcmp.gt.f32.partialorder %v1405_v59, 0.0  ;;  %v1469_v24 = vadd.f32 -0.5, %v1430_v4  ;;  %v572_v25 = vand.u32 2147483647, %v564_v16 }
  0xd8   :  { %v668_v26 = vsel %vm521_vm1, %v1037_v19, 0.0  ;;  %v575_v28 = vand.u32 2147483647, %v567_v20  ;;  %v628_v29 = vadd.f32 %v627_v10, %v626_v17  ;;  %v597_v30 = vmul.f32 %v589_v22, %v573_v14  ;;  %v697_v45 = vld [vmem:[#allocation2 + $0x11] ss:$2 sm:$0xff] }
  0xd9   :  { %v669_v31 = vadd.f32 %v668_v26, %v667_v11  ;;  %vm550_vm12 = vcmp.lt.f32.partialorder %v1405_v59, 192.0  ;;  %v600_v35 = vmul.f32 %v592_v18, %v1430_v4  ;;  %v1030_v36 = vadd.f32 -0.5, %v573_v14  ;;  %v701_v11 = vld [vmem:[#allocation2 + $0x31] ss:$2 sm:$0xff] }
  0xda   :  { %v670_v37 = vsel %vm521_vm1, %v1038_v23, 0.0  ;;  %v588_v38 = vmul.f32 0.5, %v572_v25  ;;  %vm1484_vm14 = vmand %vm542_vm10, %vm550_vm12  ;;  %vm585_vm2 = vcmp.lt.f32.partialorder %v1383_v41, 1.0  ;;  %vm581_vm3 = vcmp.lt.f32.partialorder %v573_v14, 1.0  ;;  %v691_v51 = vld [vmem:[#allocation2 + $0x20] ss:$2 sm:$0xff] }
  0xdb   :  { %v1029_v42 = vadd.f32 -0.5, %v572_v25  ;;  %v591_v43 = vmul.f32 0.5, %v575_v28  ;;  %v1040_v44 = vsel %vm1472_vm11, 1.0, %v1233_v49  ;;  %v613_v46 = vsel %vm581_vm3, %v597_v30, %v1030_v36  ;;  %v699_v52 = vld [vmem:[#allocation2 + $0x21] ss:$2 sm:$0xff] }
  0xdc   :  { %v596_v47 = vmul.f32 %v588_v38, %v572_v25  ;;  %v566_v48 = vsub.f32 %v534_v32, %v1405_v59  ;;  %v1039_v50 = vsel %vm1484_vm14, 1.0, %v1233_v49  ;;  %vm580_vm4 = vcmp.lt.f32.partialorder %v572_v25, 1.0 }
  0xdd   :  { %v599_v53 = vmul.f32 %v591_v43, %v575_v28  ;;  %v671_v54 = vadd.f32 %v670_v37, %v669_v31  ;;  %v672_v56 = vsel %vm521_vm1, %v1039_v50, 0.0  ;;  %v702_v60 = vadd.f32 %v695_v34, %v687_v33 }
  0xde   :  { %v612_v57 = vsel %vm580_vm4, %v596_v47, %v1029_v42  ;;  %v574_v58 = vand.u32 2147483647, %v566_v48  ;;  %v703_v61 = vadd.f32 %v697_v45, %v689_v40  ;;  %v621_v62 = vsel %vm1448_vm5, %v613_v46, 0.0  ;;  %v1537_v45 = vld [vmem:[%s2079_s0 + $0x8] sm:$0xff]  ;;  %v1546_v46 = vld [vmem:[%s2079_s0 + $0x10] sm:$0xff] }
  0xdf   :  { %v620_v59 = vsel %vm1452_vm6, %v612_v57, 0.0  ;;  %v673_v63 = vadd.f32 %v672_v56, %v671_v54  ;;  %v704_v1 = vadd.f32 %v699_v52, %v691_v51  ;;  %v1032_v8 = vadd.f32 -0.5, %v575_v28  ;;  %1088 = vmatprep.mubr.msk.f32.mxu1 %vm521_vm1, %v702_v60  ;;  %v1564_v51 = vld [vmem:[%s2079_s0 + $0x18] sm:$0xff]  ;;  %v1579_v56 = vld [vmem:[%s2079_s0 + $0x20] sm:$0xff] }
  0xe0   :  { %v629_v7 = vsel %vm521_vm1, %v620_v59, 0.0  ;;  %v674_v9 = vsel %vm521_vm1, %v1040_v44, 0.0  ;;  %v590_v10 = vmul.f32 0.5, %v574_v58  ;;  %vm584_vm7 = vcmp.lt.f32.partialorder %v1430_v4, 1.0  ;;  %1089 = vmatmul.mubr.msk.f32.vlgmr.msra.gmra.mxu1 %vm521_vm1, %v703_v61  ;;  %v1532_v44 = vld [vmem:[%s2079_s0] sm:$0xff]  ;;  %v1594_v61 = vld [vmem:[%s2079_s0 + $0x28] sm:$0xff] }
  0xe1   :  { %v630_v12 = vadd.f32 %v629_v7, %v628_v29  ;;  %vm583_vm8 = vcmp.lt.f32.partialorder %v575_v28, 1.0  ;;  %v675_v13 = vadd.f32 %v674_v9, %v673_v63  ;;  %v631_v14 = vsel %vm521_vm1, %v621_v62, 0.0  ;;  %1091 = vmatprep.mubr.msk.f32.mxu1 %vm521_vm1, %v704_v1 }
  0xe2   :  { %v615_v15 = vsel %vm583_vm8, %v599_v53, %v1032_v8  ;;  %v598_v16 = vmul.f32 %v590_v10, %v574_v58  ;;  %v1031_v17 = vadd.f32 -0.5, %v574_v58  ;;  %vm582_vm5 = vcmp.lt.f32.partialorder %v574_v58, 1.0 }
  0xe3   :  { %v632_v18 = vadd.f32 %v631_v14, %v630_v12  ;;  %v705_v19 = vadd.f32 %v701_v11, %v693_v5  ;;  %v677_v20 = vadd.f32 %v1462_v21, %v675_v13  ;;  %v678_v4 = vsel %vm521_vm1, %v1428_v3, 0.0  ;;  %v1609_v5 = vld [vmem:[%s2079_s0 + $0x30] sm:$0xff]  ;;  %v1624_v11 = vld [vmem:[%s2079_s0 + $0x38] sm:$0xff] }
  0xe4   :  { %v616_v22 = vsel %vm584_vm7, %v600_v35, %v1469_v24  ;;  %v614_v23 = vsel %vm582_vm5, %v598_v16, %v1031_v17  ;;  %v623_v25 = vsel %vm1472_vm11, %v615_v15, 0.0  ;;  %v617_v21 = vsel %vm585_vm2, %v1436_v6, %v1423_v2  ;;  %v1639_v16 = vld [vmem:[%s2079_s0 + $0x40] sm:$0xff] }
  0xe5   :  { %v622_v26 = vsel %vm1484_vm14, %v614_v23, 0.0  ;;  %1092 = vmatmul.mubr.msk.f32.gmra.mxu1 %vm521_vm1, %v705_v19  ;;  %v679_v28 = vadd.f32 %v678_v4, %v677_v20  ;;  %v624_v3 = vsel %vm1417_vm15, %v616_v22, 0.0  ;;  %v635_v27 = vsel %vm521_vm1, %v623_v25, 0.0  ;;  %v1654_v4 = vld [vmem:[%s2079_s0 + $0x48] sm:$0xff] }
  0xe6   :  { %v633_v29 = vsel %vm521_vm1, %v622_v26, 0.0  ;;  %v625_v31 = vsel %vm1400_vm13, %v617_v21, 0.0  ;;  %v637_v34 = vsel %vm521_vm1, %v624_v3, 0.0  ;;  %vm647_vm15 = vcmask 57344  }
  0xe7   :  { %v634_v24 = vadd.f32 %v633_v29, %v632_v18  ;;  %v680_v30 = vrot.slane %v679_v28, 4  ;;  %v639_v41 = vsel %vm521_vm1, %v625_v31, 0.0  ;;  %vm65_vm1 = vcmp.gt.f32.partialorder %v1532_v44, 0.0 }
  0xe8   :  { %vm66_vm13 = vcmp.gt.f32.partialorder %v1537_v45, 0.0  ;;  %vm81_vm6 = vcmp.lt.f32.partialorder %v1532_v44, 192.0  ;;  %vm82_vm9 = vcmp.lt.f32.partialorder %v1537_v45, 192.0  ;;  %vm67_vm11 = vcmp.gt.f32.partialorder %v1546_v46, 0.0 }
  0xe9   :  { %v636_v32 = vadd.f32 %v635_v27, %v634_v24  ;;  %v681_v33 = vadd.f32 %v680_v30, %v679_v28  ;;  %vm1548_vm10 = vmand %vm65_vm1, %vm81_vm6  ;;  %vm83_vm12 = vcmp.lt.f32.partialorder %v1546_v46, 192.0  ;;  %vm68_vm3 = vcmp.gt.f32.partialorder %v1564_v51, 0.0  ;;  %v1669_v28 = vld [vmem:[%s2079_s0 + $0x50] sm:$0xff]  ;;  %v1684_v30 = vld [vmem:[%s2079_s0 + $0x58] sm:$0xff] }
  0xea   :  { %vm1554_vm14 = vmand %vm66_vm13, %vm82_vm9  ;;  %v988_v50 = vsel %vm1548_vm10, 1.0, %v1233_v49  ;;  %vm84_vm4 = vcmp.lt.f32.partialorder %v1564_v51, 192.0  ;;  %vm69_vm8 = vcmp.gt.f32.partialorder %v1579_v56, 0.0  ;;  %vm85_vm5 = vcmp.lt.f32.partialorder %v1579_v56, 192.0 }
  0xeb   :  { %v638_v35 = vadd.f32 %v637_v34, %v636_v32  ;;  %v682_v36 = vrot.slane %v681_v33, 2  ;;  %vm1566_vm2 = vmand %vm67_vm11, %vm83_vm12  ;;  %v989_v53 = vsel %vm1554_vm14, 1.0, %v1233_v49  ;;  %v313_v54 = vsel %vm2094_vm0, %v988_v50, 0.0  ;;  %v1739_v50 = vld [vmem:[%s2079_s0 + $0x70] sm:$0xff] }
  0xec   :  { %vm1581_vm7 = vmand %vm68_vm3, %vm84_vm4  ;;  %v990_v58 = vsel %vm1566_vm2, 1.0, %v1233_v49  ;;  %v314_v60 = vsel %vm2094_vm0, %v989_v53, 0.0  ;;  %vm70_vm1 = vcmp.gt.f32.partialorder %v1594_v61, 0.0  ;;  %vm86_vm13 = vcmp.lt.f32.partialorder %v1594_v61, 192.0 }
  0xed   :  { %v683_v2 = vadd.f32 %v682_v36, %v681_v33  ;;  %v640_v6 = vadd.f32 %v639_v41, %v638_v35  ;;  %v991_v59 = vsel %vm1581_vm7, 1.0, %v1233_v49  ;;  %v315_v63 = vadd.f32 %v314_v60, %v313_v54  ;;  %vm1617_vm11 = vmand %vm70_vm1, %vm86_vm13  ;;  %v49_v33 = vld [vmem:[%s2080_s1] sm:$0xff]  ;;  %v51_v60 = vld [vmem:[%s2080_s1 + $0x10] sm:$0xff] }
  0xee   :  { %v316_v1 = vsel %vm2094_vm0, %v990_v58, 0.0  ;;  %v318_v9 = vsel %vm2094_vm0, %v991_v59, 0.0  ;;  %vm71_vm6 = vcmp.gt.f32.partialorder %v1609_v5, 0.0  ;;  %vm87_vm9 = vcmp.lt.f32.partialorder %v1609_v5, 192.0  ;;  %v1702_v35 = vld [vmem:[%s2079_s0 + $0x60] sm:$0xff] }
  0xef   :  { %v684_v37 = vrot.slane %v683_v2, 1  ;;  %v641_v0 = vrot.slane %v640_v6, 4  ;;  %v317_v8 = vadd.f32 %v316_v1, %v315_v63  ;;  %vm1626_vm12 = vmand %vm71_vm6, %vm87_vm9  ;;  %v993_v13 = vsel %vm1617_vm11, 1.0, %v1233_v49  ;;  %v52_v1 = vld [vmem:[%s2080_s1 + $0x18] sm:$0xff] }
  0xf0   :  { %vm72_vm3 = vcmp.gt.f32.partialorder %v1624_v11, 0.0  ;;  %vm88_vm4 = vcmp.lt.f32.partialorder %v1624_v11, 192.0  ;;  %v994_v18 = vsel %vm1626_vm12, 1.0, %v1233_v49  ;;  %v322_v20 = vsel %vm2094_vm0, %v993_v13, 0.0 }
  0xf1   :  { %v685_v38 = vadd.f32 %v684_v37, %v683_v2  ;;  %v642_v39 = vadd.f32 %v641_v0, %v640_v6  ;;  %v319_v14 = vadd.f32 %v318_v9, %v317_v8  ;;  %vm89_vm1 = vcmp.lt.f32.partialorder %v1639_v16, 192.0  ;;  %v50_v37 = vld [vmem:[%s2080_s1 + $0x8] sm:$0xff] }
  0xf2   :  { %v324_v26 = vsel %vm2094_vm0, %v994_v18, 0.0  ;;  %vm74_vm6 = vcmp.gt.f32.partialorder %v1654_v4, 0.0  ;;  %vm90_vm9 = vcmp.lt.f32.partialorder %v1654_v4, 192.0  ;;  %v2131_v24 = vmov 0  ;;  %v1720_v0 = vld [vmem:[%s2079_s0 + $0x68] sm:$0xff] }
  0xf3   :  { %686 = vst.msk [vmem:[#allocation8] sm:$0x1] %vm647_vm15, %v685_v38  ;;  %v643_v40 = vrot.slane %v642_v39, 2  ;;  %v2133_v34 = vmov 0  ;;  %v2137_v38 = vmov 0  ;;  %v114_v53 = vsub.f32 %v50_v37, %v1537_v45  ;;  %v1759_v45 = vld [vmem:[%s2079_s0 + $0x78] sm:$0xff] }
  0xf4   :  { %v2144_v18 = vmov 0 }
  0xf5   :  { %v644_v42 = vadd.f32 %v643_v40, %v642_v39  ;;  %v113_v39 = vsub.f32 %v49_v33, %v1532_v44  ;;  %v2139_v44 = vmov 0  ;;  %v57_v33 = vld [vmem:[%s2080_s1 + $0x40] sm:$0xff] }
  0xf7   :  { %v645_v55 = vrot.slane %v644_v42, 1  ;;  %v1768_v8 = vand.u32 2147483647, %v113_v39 }
  0xf9   :  { %v646_v43 = vadd.f32 %v645_v55, %v644_v42 }
  0xfb   :  { %648 = vst.msk [vmem:[#allocation7] sm:$0x1] %vm647_vm15, %v646_v43  ;;  %vm1596_vm15 = vmand %vm69_vm8, %vm85_vm5  ;;  %vm73_vm5 = vcmp.gt.f32.partialorder %v1639_v16, 0.0 }
  0xfc   :  { %v992_v7 = vsel %vm1596_vm15, 1.0, %v1233_v49  ;;  %vm1641_vm8 = vmand %vm72_vm3, %vm88_vm4  ;;  %vm75_vm3 = vcmp.gt.f32.partialorder %v1669_v28, 0.0  ;;  %vm91_vm4 = vcmp.lt.f32.partialorder %v1669_v28, 192.0 }
  0xfd   :  { %v320_v15 = vsel %vm2094_vm0, %v992_v7, 0.0  ;;  %vm1656_vm13 = vmand %vm73_vm5, %vm89_vm1  ;;  %v995_v23 = vsel %vm1641_vm8, 1.0, %v1233_v49  ;;  %vm76_vm1 = vcmp.gt.f32.partialorder %v1684_v30, 0.0 }
  0xfe   :  { %v321_v19 = vadd.f32 %v320_v15, %v319_v14  ;;  %v996_v21 = vsel %vm1656_vm13, 1.0, %v1233_v49  ;;  %v326_v3 = vsel %vm2094_vm0, %v995_v23, 0.0  ;;  %vm1677_vm5 = vmand %vm74_vm6, %vm90_vm9  ;;  %vm92_vm6 = vcmp.lt.f32.partialorder %v1684_v30, 192.0  ;;  %v53_v15 = vld [vmem:[%s2080_s1 + $0x20] sm:$0xff]  ;;  %v54_v23 = vld [vmem:[%s2080_s1 + $0x28] sm:$0xff] }
  0xff   :  { %v2132_v24 = vsel %vm1677_vm5, 4294967295, %v2131_v24  ;;  %v997_v27 = vsel %vm1677_vm5, 1.0, %v1233_v49  ;;  %v328_v32 = vsel %vm2094_vm0, %v996_v21, 0.0  ;;  %vm1695_vm9 = vmand %vm75_vm3, %vm91_vm4  ;;  %vm77_vm3 = vcmp.gt.f32.partialorder %v1702_v35, 0.0 }
 0x100   :  { %v323_v25 = vadd.f32 %v322_v20, %v321_v19  ;;  %v2134_v34 = vsel %vm1695_vm9, 4294967295, %v2133_v34  ;;  %vm1704_vm5 = vmand %vm76_vm1, %vm92_vm6  ;;  %v998_v41 = vsel %vm1695_vm9, 1.0, %v1233_v49  ;;  %v330_v6 = vsel %vm2094_vm0, %v997_v27, 0.0  ;;  %v56_v27 = vld [vmem:[%s2080_s1 + $0x38] sm:$0xff] }
 0x101   :  { %vm93_vm4 = vcmp.lt.f32.partialorder %v1702_v35, 192.0  ;;  %v999_v40 = vsel %vm1704_vm5, 1.0, %v1233_v49  ;;  %v332_v55 = vsel %vm2094_vm0, %v998_v41, 0.0  ;;  %vm78_vm6 = vcmp.gt.f32.partialorder %v1720_v0, 0.0  ;;  %v58_v41 = vld [vmem:[%s2080_s1 + $0x48] sm:$0xff] }
 0x102   :  { %v325_v29 = vadd.f32 %v324_v26, %v323_v25  ;;  %vm1722_vm1 = vmand %vm77_vm3, %vm93_vm4  ;;  %vm94_vm9 = vcmp.lt.f32.partialorder %v1720_v0, 192.0  ;;  %v334_v58 = vsel %vm2094_vm0, %v999_v40, 0.0  ;;  %vm79_vm4 = vcmp.gt.f32.partialorder %v1739_v50, 0.0 }
 0x103   :  { %v2138_v38 = vsel %vm1722_vm1, 4294967295, %v2137_v38  ;;  %v1000_v43 = vsel %vm1722_vm1, 1.0, %v1233_v49  ;;  %vm1741_vm3 = vmand %vm78_vm6, %vm94_vm9  ;;  %vm95_vm1 = vcmp.lt.f32.partialorder %v1739_v50, 192.0  ;;  %vm80_vm6 = vcmp.gt.f32.partialorder %v1759_v45, 0.0 }
 0x104   :  { %v327_v31 = vadd.f32 %v326_v3, %v325_v29  ;;  %v2140_v44 = vsel %vm1741_vm3, 4294967295, %v2139_v44  ;;  %v1001_v59 = vsel %vm1741_vm3, 1.0, %v1233_v49  ;;  %v336_v63 = vsel %vm2094_vm0, %v1000_v43, 0.0  ;;  %vm1764_vm9 = vmand %vm79_vm4, %vm95_vm1  ;;  %v55_v3 = vld [vmem:[%s2080_s1 + $0x30] sm:$0xff] }
 0x105   :  { %vm96_vm0 = vcmp.lt.f32.partialorder %v1759_v45, 192.0  ;;  %v1002_v13 = vsel %vm1764_vm9, 1.0, %v1233_v49  ;;  %vm2143_vm3 = vcmask 130048   ;;  %v115_v19 = vsub.f32 %v51_v60, %v1546_v46 }
 0x106   :  { %v329_v2 = vadd.f32 %v328_v32, %v327_v31  ;;  %v338_v14 = vsel %vm2143_vm3, %v1001_v59, 0.0  ;;  %vm1779_vm1 = vmand %vm80_vm6, %vm96_vm0  ;;  %v116_v25 = vsub.f32 %v52_v1, %v1564_v51  ;;  %v1788_v26 = vand.u32 2147483647, %v114_v53 }
 0x107   :  { %v2145_v18 = vsel %vm1779_vm1, 4294967295, %v2144_v18  ;;  %v1003_v21 = vsel %vm1779_vm1, 1.0, %v1233_v49  ;;  %v340_v29 = vsel %vm2143_vm3, %v1002_v13, 0.0  ;;  %v117_v31 = vsub.f32 %v53_v15, %v1579_v56  ;;  %vm2146_vm0 = vmmov %vm2143_vm3 }
 0x108   :  { %v331_v42 = vadd.f32 %v330_v6, %v329_v2  ;;  %v342_v51 = vsel %vm2146_vm0, %v1003_v21, 0.0  ;;  %v161_v32 = vmul.f32 0.5, %v1768_v8  ;;  %v118_v2 = vsub.f32 %v54_v23, %v1594_v61  ;;  %v60_v61 = vld [vmem:[%s2080_s1 + $0x58] sm:$0xff] }
 0x109   :  { %v119_v37 = vsub.f32 %v55_v3, %v1609_v5  ;;  %v1811_v56 = vand.u32 2147483647, %v115_v19  ;;  %v1813_v39 = vand.u32 2147483647, %v116_v25  ;;  %v162_v40 = vmul.f32 0.5, %v1788_v26 }
 0x10a   :  { %v333_v54 = vadd.f32 %v332_v55, %v331_v42  ;;  %v59_v42 = vld [vmem:[%s2080_s1 + $0x50] sm:$0xff]  ;;  %v120_v55 = vsub.f32 %v56_v27, %v1624_v11 }
 0x10c   :  { %v335_v9 = vadd.f32 %v334_v58, %v333_v54 }
 0x10e   :  { %v337_v20 = vadd.f32 %v336_v63, %v335_v9 }
 0x110   :  { %v339_v46 = vadd.f32 %v338_v14, %v337_v20 }
 0x112   :  { %v341_v6 = vadd.f32 %v340_v29, %v339_v46 }
 0x114   :  { %v343_v43 = vadd.f32 %v342_v51, %v341_v6 }
 0x115   :  { %1116 = shalt.err (!%p1113_p4)
}
 0x116   :  { %929 = dma.vmem_to_hbm [thread:$0]  %s927_s17, 16, %s2088_s9, [#allocation9]   ;;  %vm145_vm4 = vcmp.lt.f32.partialorder %v1768_v8, 1.0  ;;  %v121_v5 = vsub.f32 %v57_v33, %v1639_v16  ;;  %v122_v11 = vsub.f32 %v58_v41, %v1654_v4  ;;  %v1830_v53 = vand.u32 2147483647, %v117_v31  ;;  %v61_v58 = vld [vmem:[%s2080_s1 + $0x60] sm:$0xff] }
 0x117   :  { %v177_v54 = vmul.f32 %v161_v32, %v1768_v8  ;;  %v1836_v60 = vand.u32 2147483647, %v118_v2  ;;  %v344_v59 = vrot.slane %v343_v43, 4  ;;  %v123_v63 = vsub.f32 %v59_v42, %v1669_v28  ;;  %v1872_v31 = vld [vmem:[%s2080_s1 + $0x70] sm:$0xff]  ;;  %s1235_s4 = smov [#allocation5]   ;;  %s1236_s29 = smov [#allocation7]  }
 0x118   :  { %v124_v16 = vsub.f32 %v60_v61, %v1684_v30  ;;  %v1842_v4 = vand.u32 2147483647, %v119_v37  ;;  %v163_v1 = vmul.f32 0.5, %v1811_v56  ;;  %v1845_v9 = vand.u32 2147483647, %v120_v55  ;;  %v62_v30 = vld [vmem:[%s2080_s1 + $0x68] sm:$0xff] }
 0x119   :  { %v345_v13 = vadd.f32 %v344_v59, %v343_v43  ;;  %v164_v14 = vmul.f32 0.5, %v1813_v39  ;;  %v125_v15 = vsub.f32 %v61_v58, %v1702_v35  ;;  %v1850_v19 = vand.u32 2147483647, %v121_v5  ;;  %s906_s2 = sshll.u32 %s1235_s4, 4  ;;  %s916_s30 = sshll.u32 %s1236_s29, 4  ;;  %s907_s2 = int_to_ptr.vmem [resolvable:$true] %s906_s2  ;;  %s1906_s30 = int_to_ptr.vmem [resolvable:$true] %s916_s30 }
 0x11a   :  { %v1852_v20 = vand.u32 2147483647, %v122_v11  ;;  %v165_v28 = vmul.f32 0.5, %v1830_v53  ;;  %v178_v25 = vmul.f32 %v162_v40, %v1788_v26  ;;  %v972_v21 = vadd.f32 -0.5, %v1768_v8  ;;  %s1125_s12 = scalar_lea.vmem %s907_s2, 16  ;;  %s1129_s13 = scalar_lea.vmem %s907_s2, 32 }
 0x11b   :  { %v346_v23 = vrot.slane %v345_v13, 2  ;;  %v973_v29 = vadd.f32 -0.5, %v1788_v26  ;;  %v1862_v35 = vand.u32 2147483647, %v123_v63  ;;  %v1864_v3 = vand.u32 2147483647, %v124_v16  ;;  %p1126_p5 = scmp.ne.s32.totalorder %s907_s2, %s1125_s12  ;;  %p1130_p6 = scmp.lt.s32.totalorder %s907_s2, %s907_s2 }
 0x11c   :  { %v179_v46 = vmul.f32 %v163_v1, %v1811_v56  ;;  %v974_v27 = vadd.f32 -0.5, %v1811_v56  ;;  %v166_v32 = vmul.f32 0.5, %v1836_v60  ;;  %v180_v33 = vmul.f32 %v164_v14, %v1813_v39  ;;  %p1131_p7 = scmp.lt.s32.totalorder %s1129_s13, %s1125_s12 }
 0x11d   :  { %v347_v51 = vadd.f32 %v346_v23, %v345_v13  ;;  %v975_v41 = vadd.f32 -0.5, %v1813_v39  ;;  %v126_v2 = vsub.f32 %v62_v30, %v1720_v0  ;;  %v1878_v6 = vand.u32 2147483647, %v125_v15 }
 0x11e   :  { %v167_v37 = vmul.f32 0.5, %v1842_v4  ;;  %v181_v40 = vmul.f32 %v165_v28, %v1830_v53  ;;  %v976_v61 = vadd.f32 -0.5, %v1830_v53  ;;  %v209_v55 = vsel %vm145_vm4, %v177_v54, %v972_v21  ;;  %p1132_p8 = por %p1131_p7, %p1130_p6 }
 0x11f   :  { %v348_v42 = vrot.slane %v347_v51, 1  ;;  %vm2147_vm0 = vcmp.lt.f32.partialorder %v1788_v26, 1.0  ;;  %v127_v0 = vsub.f32 %v1872_v31, %v1739_v50  ;;  %vm279_vm3 = vcmask 122880  }
 0x120   :  { %v210_v43 = vsel %vm2147_vm0, %v178_v25, %v973_v29  ;;  %vm153_vm6 = vcmp.lt.f32.partialorder %v1850_v19, 1.0  ;;  %v168_v5 = vmul.f32 0.5, %v1845_v9  ;;  %vm2148_vm1 = vcmp.lt.f32.partialorder %v1811_v56, 1.0  ;;  %p1133_p9 = pnand %p1132_p8, %p1126_p5 }
 0x121   :  { %v211_v11 = vsel %vm2148_vm1, %v179_v46, %v974_v27  ;;  %v349_v58 = vadd.f32 %v348_v42, %v347_v51  ;;  %v182_v8 = vmul.f32 %v166_v32, %v1836_v60  ;;  %v977_v26 = vadd.f32 -0.5, %v1836_v60 }
 0x122   :  { %vm2149_vm4 = vcmp.lt.f32.partialorder %v1813_v39, 1.0  ;;  %v1898_v59 = vand.u32 2147483647, %v126_v2  ;;  %vm154_vm0 = vcmp.lt.f32.partialorder %v1852_v20, 1.0  ;;  %v169_v63 = vmul.f32 0.5, %v1850_v19 }
 0x123   :  { %v212_v54 = vsel %vm2149_vm4, %v180_v33, %v975_v41  ;;  %v225_v16 = vsel %vm1548_vm10, %v209_v55, 0.0  ;;  %v226_v56 = vsel %vm1554_vm14, %v210_v43, 0.0  ;;  %350 = vst.msk [vmem:[#allocation5] sm:$0x1] %vm279_vm3, %v349_v58  ;;  %v183_v1 = vmul.f32 %v167_v37, %v1842_v4 }
 0x124   :  { %v978_v39 = vadd.f32 -0.5, %v1842_v4  ;;  %vm2150_vm1 = vcmp.lt.f32.partialorder %v1830_v53, 1.0  ;;  %v227_v14 = vsel %vm1566_vm2, %v211_v11, 0.0 }
 0x125   :  { %v213_v13 = vsel %vm2150_vm1, %v181_v40, %v976_v61 }
 0x126   :  { %1136 = shalt.err (!%p1133_p9)
}
 0x127   :  { %909 = dma.vmem_to_hbm [thread:$0]  %s907_s2, 16, %s2086_s7, [#allocation6]   ;;  %vm155_vm10 = vcmp.lt.f32.partialorder %v1862_v35, 1.0  ;;  %v170_v47 = vmul.f32 0.5, %v1852_v20  ;;  %v184_v48 = vmul.f32 %v168_v5, %v1845_v9  ;;  %v228_v52 = vsel %vm1581_vm7, %v212_v54, 0.0  ;;  %v64_v53 = vld [vmem:[%s2080_s1 + $0x78] sm:$0xff] }
 0x128   :  { %v979_v15 = vadd.f32 -0.5, %v1845_v9  ;;  %vm2151_vm14 = vcmp.lt.f32.partialorder %v1836_v60, 1.0  ;;  %vm2152_vm2 = vcmask 130048   ;;  %s1145_s7 = scalar_lea.vmem %s1906_s30, 16  ;;  %s1149_s18 = scalar_lea.vmem %s1906_s30, 32 }
 0x129   :  { %v214_v28 = vsel %vm2151_vm14, %v182_v8, %v977_v26  ;;  %v242_v30 = vsel %vm2152_vm2, %v225_v16, 0.0  ;;  %vm2153_vm4 = vmmov %vm2152_vm2  ;;  %p1146_p10 = scmp.ne.s32.totalorder %s1906_s30, %s1145_s7  ;;  %p1150_p11 = scmp.lt.s32.totalorder %s1906_s30, %s1906_s30 }
 0x12a   :  { %v243_v23 = vsel %vm2153_vm4, %v226_v56, 0.0  ;;  %p1151_p12 = scmp.lt.s32.totalorder %s1149_s18, %s1145_s7 }
 0x12c   :  { %p1152_p13 = por %p1151_p12, %p1150_p11 }
 0x12e   :  { %p1153_p0 = pnand %p1152_p13, %p1146_p10 }
 0x130   :  { %1156 = shalt.err (!%p1153_p0)
}
 0x131   :  { %919 = dma.vmem_to_hbm [thread:$0]  %s1906_s30, 16, %s2087_s8, [#allocation6]   ;;  %v171_v57 = vmul.f32 0.5, %v1862_v35  ;;  %v229_v60 = vsel %vm1596_vm15, %v213_v13, 0.0  ;;  %v244_v25 = vadd.f32 %v243_v23, %v242_v30  ;;  %vm2154_vm7 = vmmov %vm2152_vm2  ;;  %v185_v29 = vmul.f32 %v169_v63, %v1850_v19 }
 0x132   :  { %v245_v21 = vsel %vm2154_vm7, %v227_v14, 0.0  ;;  %v980_v46 = vadd.f32 -0.5, %v1850_v19  ;;  %vm2155_vm1 = vcmp.lt.f32.partialorder %v1842_v4, 1.0  ;;  %vm2156_vm14 = vmmov %vm2152_vm2  ;;  %v128_v32 = vsub.f32 %v64_v53, %v1759_v45  ;;  %s1237_s8 = smov [#allocation3]  }
 0x133   :  { %v215_v27 = vsel %vm2155_vm1, %v183_v1, %v978_v39  ;;  %v247_v51 = vsel %vm2156_vm14, %v228_v52, 0.0  ;;  %v172_v33 = vmul.f32 0.5, %v1864_v3  ;;  %v230_v62 = vsel %vm1617_vm11, %v214_v28, 0.0  ;;  %vm2158_vm11 = vmmov %vm2152_vm2  ;;  %s896_s5 = sshll.u32 %s1237_s8, 4  ;;  %s897_s5 = int_to_ptr.vmem [resolvable:$true] %s896_s5 }
 0x134   :  { %v246_v41 = vadd.f32 %v245_v21, %v244_v25  ;;  %v186_v2 = vmul.f32 %v170_v47, %v1852_v20  ;;  %v981_v37 = vadd.f32 -0.5, %v1852_v20  ;;  %vm2157_vm15 = vcmp.lt.f32.partialorder %v1845_v9, 1.0  ;;  %vm2164_vm1 = vmmov %vm2152_vm2  ;;  %s1165_s20 = scalar_lea.vmem %s897_s5, 16  ;;  %s1169_s21 = scalar_lea.vmem %s897_s5, 32 }
 0x135   :  { %v216_v40 = vsel %vm2157_vm15, %v184_v48, %v979_v15  ;;  %v249_v4 = vsel %vm2152_vm2, %v229_v60, 0.0  ;;  %v143_v42 = vand.u32 2147483647, %v127_v0  ;;  %v173_v45 = vmul.f32 0.5, %v1878_v6  ;;  %vm2165_vm15 = vmmov %vm2164_vm1  ;;  %p1166_p1 = scmp.ne.s32.totalorder %s897_s5, %s1165_s20  ;;  %p1170_p2 = scmp.lt.s32.totalorder %s897_s5, %s897_s5 }
 0x136   :  { %v231_v10 = vsel %vm1626_vm12, %v215_v27, 0.0  ;;  %v248_v61 = vadd.f32 %v247_v51, %v246_v41  ;;  %v187_v55 = vmul.f32 %v171_v57, %v1862_v35  ;;  %v982_v43 = vadd.f32 -0.5, %v1862_v35  ;;  %vm2159_vm12 = vmmov %vm2152_vm2  ;;  %p1171_p3 = scmp.lt.s32.totalorder %s1169_s21, %s1165_s20 }
 0x137   :  { %v217_v9 = vsel %vm153_vm6, %v185_v29, %v980_v46  ;;  %v251_v5 = vsel %vm2158_vm11, %v230_v62, 0.0  ;;  %v144_v11 = vand.u32 2147483647, %v128_v32  ;;  %v174_v58 = vmul.f32 0.5, %v1898_v59 }
 0x138   :  { %v232_v50 = vsel %vm1641_vm8, %v216_v40, 0.0  ;;  %v250_v31 = vadd.f32 %v249_v4, %v248_v61  ;;  %v188_v12 = vmul.f32 %v172_v33, %v1864_v3  ;;  %v983_v0 = vadd.f32 -0.5, %v1864_v3  ;;  %vm2160_vm8 = vmmov %vm2152_vm2  ;;  %p1172_p4 = por %p1171_p3, %p1170_p2 }
 0x139   :  { %v218_v8 = vsel %vm154_vm0, %v186_v2, %v981_v37  ;;  %v253_v26 = vsel %vm2159_vm12, %v231_v10, 0.0  ;;  %vm156_vm6 = vcmp.lt.f32.partialorder %v1864_v3, 1.0  ;;  %v175_v19 = vmul.f32 0.5, %v143_v42  ;;  %vm2167_vm12 = vmmov %vm2164_vm1 }
 0x13a   :  { %v233_v54 = vsel %vm1656_vm13, %v217_v9, 0.0  ;;  %v252_v63 = vadd.f32 %v251_v5, %v250_v31  ;;  %v189_v17 = vmul.f32 %v173_v45, %v1878_v6  ;;  %v984_v16 = vadd.f32 -0.5, %v1878_v6  ;;  %vm2162_vm13 = vmmov %vm2152_vm2  ;;  %p1173_p5 = pnand %p1172_p4, %p1166_p1 }
 0x13b   :  { %v219_v56 = vsel %vm155_vm10, %v187_v55, %v982_v43  ;;  %v255_v1 = vsel %vm2160_vm8, %v232_v50, 0.0  ;;  %vm157_vm0 = vcmp.lt.f32.partialorder %v1878_v6, 1.0  ;;  %v176_v20 = vmul.f32 0.5, %v144_v11  ;;  %vm2170_vm8 = vmmov %vm2164_vm1 }
 0x13c   :  { %vm2161_vm4 = vnez %v2132_v24  ;;  %v254_v39 = vadd.f32 %v253_v26, %v252_v63  ;;  %v190_v22 = vmul.f32 %v174_v58, %v1898_v59  ;;  %v985_v13 = vadd.f32 -0.5, %v1898_v59 }
 0x13d   :  { %v234_v3 = vsel %vm2161_vm4, %v218_v8, 0.0  ;;  %v220_v14 = vsel %vm156_vm6, %v188_v12, %v983_v0  ;;  %v257_v47 = vsel %vm2162_vm13, %v233_v54, 0.0  ;;  %vm158_vm7 = vcmp.lt.f32.partialorder %v1898_v59, 1.0  ;;  %vm2172_vm4 = vmmov %vm2164_vm1 }
 0x13e   :  { %vm2163_vm10 = vnez %v2134_v34  ;;  %v256_v48 = vadd.f32 %v255_v1, %v254_v39  ;;  %v191_v52 = vmul.f32 %v175_v19, %v143_v42  ;;  %v986_v6 = vadd.f32 -0.5, %v143_v42  ;;  %vm2173_vm13 = vmmov %vm2164_vm1 }
 0x13f   :  { %v235_v35 = vsel %vm2163_vm10, %v219_v56, 0.0  ;;  %v221_v53 = vsel %vm157_vm0, %v189_v17, %v984_v16  ;;  %v259_v24 = vsel %vm2164_vm1, %v234_v3, 0.0  ;;  %vm159_vm14 = vcmp.lt.f32.partialorder %v143_v42, 1.0 }
 0x140   :  { %v236_v15 = vsel %vm1704_vm5, %v220_v14, 0.0  ;;  %v258_v28 = vadd.f32 %v257_v47, %v256_v48  ;;  %v192_v30 = vmul.f32 %v176_v20, %v144_v11  ;;  %v987_v23 = vadd.f32 -0.5, %v144_v11  ;;  %vm2169_vm5 = vmmov %vm2164_vm1 }
 0x141   :  { %v222_v57 = vsel %vm158_vm7, %v190_v22, %v985_v13  ;;  %v261_v60 = vsel %vm2165_vm15, %v235_v35, 0.0  ;;  %vm160_vm2 = vcmp.lt.f32.partialorder %v144_v11, 1.0  ;;  %vm2166_vm11 = vnez %v2138_v38 }
 0x142   :  { %v237_v34 = vsel %vm2166_vm11, %v221_v53, 0.0  ;;  %v260_v59 = vadd.f32 %v259_v24, %v258_v28  ;;  %v223_v25 = vsel %vm159_vm14, %v191_v52, %v986_v6  ;;  %v263_v21 = vsel %vm2167_vm12, %v236_v15, 0.0 }
 0x143   :  { %vm2168_vm6 = vnez %v2140_v44  ;;  %v224_v36 = vsel %vm160_vm2, %v192_v30, %v987_v23  ;;  %v265_v27 = vsel %vm2169_vm5, %v237_v34, 0.0  ;;  %v239_v51 = vsel %vm1764_vm9, %v223_v25, 0.0 }
 0x144   :  { %v238_v29 = vsel %vm2168_vm6, %v222_v57, 0.0  ;;  %v262_v46 = vadd.f32 %v261_v60, %v260_v59  ;;  %vm2171_vm0 = vnez %v2145_v18  ;;  %v269_v41 = vsel %vm2172_vm4, %v239_v51, 0.0 }
 0x145   :  { %v267_v33 = vsel %vm2170_vm8, %v238_v29, 0.0  ;;  %v240_v38 = vsel %vm2171_vm0, %v224_v36, 0.0 }
 0x146   :  { %v264_v32 = vadd.f32 %v263_v21, %v262_v46  ;;  %v271_v44 = vsel %vm2173_vm13, %v240_v38, 0.0 }
 0x148   :  { %v266_v62 = vadd.f32 %v265_v27, %v264_v32 }
 0x14a   :  { %v268_v2 = vadd.f32 %v267_v33, %v266_v62 }
 0x14c   :  { %v270_v37 = vadd.f32 %v269_v41, %v268_v2 }
 0x14e   :  { %v272_v40 = vadd.f32 %v271_v44, %v270_v37 }
 0x150   :  { %v273_v4 = vrot.slane %v272_v40, 4 }
 0x152   :  { %v274_v42 = vadd.f32 %v273_v4, %v272_v40 }
 0x154   :  { %v275_v45 = vrot.slane %v274_v42, 2 }
 0x156   :  { %v276_v10 = vadd.f32 %v275_v45, %v274_v42 }
 0x158   :  { %v277_v7 = vrot.slane %v276_v10, 1 }
 0x15a   :  { %v278_v61 = vadd.f32 %v277_v7, %v276_v10 }
 0x15c   :  { %280 = vst.msk [vmem:[#allocation3] sm:$0x1] %vm279_vm3, %v278_v61 }
 0x15d   :  { %1176 = shalt.err (!%p1173_p5)
}
 0x15e   :  { %899 = dma.vmem_to_hbm [thread:$0]  %s897_s5, 16, %s2085_s6, [#allocation4]   ;;  %v805_v18 = vld [vmem:[%s2082_s3 + $0x8] sm:$0xff]  ;;  %v804_v9 = vld [vmem:[%s2082_s3] sm:$0xff]  ;;  %v807_v0 = vld [vmem:[%s2082_s3 + $0x18] sm:$0xff]  ;;  %vm852_vm15 = vcmask 31744  }
 0x15f   :  { %v806_v16 = vld [vmem:[%s2082_s3 + $0x10] sm:$0xff]  ;;  %s1238_s3 = smov [#allocation11]   ;;  %s1239_s2 = smov [#allocation10]  }
 0x160   :  { %s946_s4 = sshll.u32 %s1238_s3, 4  ;;  %s936_s29 = sshll.u32 %s1239_s2, 4  ;;  %s947_s4 = int_to_ptr.vmem [resolvable:$true] %s946_s4  ;;  %s937_s29 = int_to_ptr.vmem [resolvable:$true] %s936_s29 }
 0x161   :  { %s1185_s30 = scalar_lea.vmem %s947_s4, 16  ;;  %s1189_s12 = scalar_lea.vmem %s947_s4, 32 }
 0x162   :  { %p1186_p6 = scmp.ne.s32.totalorder %s947_s4, %s1185_s30  ;;  %p1190_p7 = scmp.lt.s32.totalorder %s947_s4, %s947_s4 }
 0x163   :  { %p1191_p8 = scmp.lt.s32.totalorder %s1189_s12, %s1185_s30 }
 0x165   :  { %p1192_p9 = por %p1191_p8, %p1190_p7 }
 0x167   :  { %p1193_p10 = pnand %p1192_p9, %p1186_p6 }
 0x1a0   :  { %v1090_v55 = vpop.f32.mrf.mxu1 }
 0x1a1   :  { %vm809_vm9 = vcmp.gt.f32.partialorder %v1090_v55, 0.0  ;;  %vm813_vm7 = vcmp.lt.f32.partialorder %v1090_v55, 192.0  ;;  %v821_v43 = vsub.f32 %v805_v18, %v1090_v55 }
 0x1a2   :  { %v785_v5 = vpop.f32.mrf.mxu1  ;;  %vm2021_vm3 = vmand %vm809_vm9, %vm813_vm7  ;;  %vm866_vm7 = vcmask 24576  }
 0x1a3   :  { %v825_v58 = vand.u32 2147483647, %v821_v43  ;;  %vm808_vm10 = vcmp.gt.f32.partialorder %v785_v5, 0.0  ;;  %vm812_vm1 = vcmp.lt.f32.partialorder %v785_v5, 192.0  ;;  %v820_v31 = vsub.f32 %v804_v9, %v785_v5 }
 0x1a4   :  { %vm2025_vm14 = vmand %vm808_vm10, %vm812_vm1  ;;  %v1052_v26 = vsel %vm2021_vm3, 1.0, %v1233_v49 }
 0x1a5   :  { %v1093_v12 = vpop.f32.mrf.mxu1  ;;  %v833_v8 = vmul.f32 0.5, %v825_v58  ;;  %v824_v19 = vand.u32 2147483647, %v820_v31  ;;  %v1051_v63 = vsel %vm2025_vm14, 1.0, %v1233_v49  ;;  %v1048_v3 = vadd.f32 -0.5, %v825_v58 }
 0x1a6   :  { %vm811_vm2 = vcmp.gt.f32.partialorder %v1093_v12, 0.0  ;;  %vm815_vm11 = vcmp.lt.f32.partialorder %v1093_v12, 192.0  ;;  %v823_v17 = vsub.f32 %v807_v0, %v1093_v12  ;;  %v877_v39 = vsel %vm852_vm15, %v1052_v26, 0.0 }
 0x1a7   :  { %v795_v54 = vpop.f32.mrf.mxu1  ;;  %v837_v56 = vmul.f32 %v833_v8, %v825_v58  ;;  %v832_v1 = vmul.f32 0.5, %v824_v19  ;;  %vm2041_vm6 = vmand %vm811_vm2, %vm815_vm11  ;;  %v1047_v14 = vadd.f32 -0.5, %v824_v19  ;;  %v876_v47 = vsel %vm852_vm15, %v1051_v63, 0.0 }
 0x1a8   :  { %vm810_vm12 = vcmp.gt.f32.partialorder %v795_v54, 0.0  ;;  %v827_v22 = vand.u32 2147483647, %v823_v17  ;;  %vm814_vm5 = vcmp.lt.f32.partialorder %v795_v54, 192.0  ;;  %v822_v48 = vsub.f32 %v806_v16, %v795_v54 }
 0x1a9   :  { %v836_v13 = vmul.f32 %v832_v1, %v824_v19  ;;  %vm2047_vm8 = vmand %vm810_vm12, %vm814_vm5  ;;  %vm829_vm0 = vcmp.lt.f32.partialorder %v825_v58, 1.0  ;;  %vm828_vm4 = vcmp.lt.f32.partialorder %v824_v19, 1.0  ;;  %v1054_v6 = vsel %vm2041_vm6, 1.0, %v1233_v49 }
 0x1aa   :  { %v835_v52 = vmul.f32 0.5, %v827_v22  ;;  %v845_v53 = vsel %vm829_vm0, %v837_v56, %v1048_v3  ;;  %v826_v15 = vand.u32 2147483647, %v822_v48  ;;  %v1053_v28 = vsel %vm2047_vm8, 1.0, %v1233_v49 }
 0x1ab   :  { %v844_v24 = vsel %vm828_vm4, %v836_v13, %v1047_v14  ;;  %v878_v23 = vadd.f32 %v877_v39, %v876_v47  ;;  %v879_v60 = vsel %vm852_vm15, %v1053_v28, 0.0  ;;  %v1050_v34 = vadd.f32 -0.5, %v827_v22 }
 0x1ac   :  { %v848_v30 = vsel %vm2025_vm14, %v844_v24, 0.0  ;;  %v839_v57 = vmul.f32 %v835_v52, %v827_v22  ;;  %v834_v59 = vmul.f32 0.5, %v826_v15  ;;  %v849_v25 = vsel %vm2021_vm3, %v845_v53, 0.0 }
 0x1ad   :  { %vm831_vm13 = vcmp.lt.f32.partialorder %v827_v22, 1.0  ;;  %v881_v21 = vsel %vm852_vm15, %v1054_v6, 0.0  ;;  %v880_v29 = vadd.f32 %v879_v60, %v878_v23  ;;  %v853_v46 = vsel %vm852_vm15, %v848_v30, 0.0 }
 0x1ae   :  { %v847_v36 = vsel %vm831_vm13, %v839_v57, %v1050_v34  ;;  %v838_v49 = vmul.f32 %v834_v59, %v826_v15  ;;  %v1049_v27 = vadd.f32 -0.5, %v826_v15  ;;  %vm830_vm9 = vcmp.lt.f32.partialorder %v826_v15, 1.0 }
 0x1af   :  { %v882_v51 = vadd.f32 %v881_v21, %v880_v29  ;;  %v854_v32 = vsel %vm852_vm15, %v849_v25, 0.0  ;;  %v851_v62 = vsel %vm2041_vm6, %v847_v36, 0.0 }
 0x1b0   :  { %v846_v33 = vsel %vm830_vm9, %v838_v49, %v1049_v27  ;;  %v855_v38 = vadd.f32 %v854_v32, %v853_v46  ;;  %v858_v4 = vsel %vm852_vm15, %v851_v62, 0.0 }
 0x1b1   :  { %v850_v41 = vsel %vm2047_vm8, %v846_v33, 0.0  ;;  %v883_v2 = vrot.slane %v882_v51, 4 }
 0x1b2   :  { %v856_v44 = vsel %vm852_vm15, %v850_v41, 0.0 }
 0x1b3   :  { %v857_v37 = vadd.f32 %v856_v44, %v855_v38  ;;  %v884_v40 = vadd.f32 %v883_v2, %v882_v51 }
 0x1b5   :  { %v859_v42 = vadd.f32 %v858_v4, %v857_v37  ;;  %v885_v45 = vrot.slane %v884_v40, 2 }
 0x1b7   :  { %v860_v10 = vrot.slane %v859_v42, 4  ;;  %v886_v7 = vadd.f32 %v885_v45, %v884_v40 }
 0x1b9   :  { %v861_v61 = vadd.f32 %v860_v10, %v859_v42  ;;  %v887_v18 = vrot.slane %v886_v7, 1 }
 0x1bb   :  { %v862_v55 = vrot.slane %v861_v61, 2  ;;  %v888_v43 = vadd.f32 %v887_v18, %v886_v7 }
 0x1bd   :  { %v863_v9 = vadd.f32 %v862_v55, %v861_v61  ;;  %889 = vst.msk [vmem:[#allocation11] sm:$0x1] %vm866_vm7, %v888_v43 }
 0x1be   :  { %1196 = shalt.err (!%p1193_p10)
}
 0x1bf   :  { %949 = dma.vmem_to_hbm [thread:$0]  %s947_s4, 16, %s2090_s11, [#allocation12]   ;;  %v864_v5 = vrot.slane %v863_v9, 1 }
 0x1c0   :  { %s1205_s15 = scalar_lea.vmem %s937_s29, 16  ;;  %s1209_s16 = scalar_lea.vmem %s937_s29, 32 }
 0x1c1   :  { %v865_v11 = vadd.f32 %v864_v5, %v863_v9  ;;  %p1206_p11 = scmp.ne.s32.totalorder %s937_s29, %s1205_s15  ;;  %p1210_p12 = scmp.lt.s32.totalorder %s937_s29, %s937_s29 }
 0x1c2   :  { %p1211_p13 = scmp.lt.s32.totalorder %s1209_s16, %s1205_s15 }
 0x1c3   :  { %867 = vst.msk [vmem:[#allocation10] sm:$0x1] %vm866_vm7, %v865_v11 }
 0x1c4   :  { %p1212_p0 = por %p1211_p13, %p1210_p12 }
 0x1c6   :  { %p1213_p1 = pnand %p1212_p0, %p1206_p11 }
 0x1c8   :  { %1216 = shalt.err (!%p1213_p1)
}
 0x1c9   :  { %939 = dma.vmem_to_hbm [thread:$0]  %s937_s29, 16, %s2089_s10, [#allocation9]  }
 0x1ca   :  { %1225 = dma.done.wait [#allocation4], 16  }
 0x1cb   :  { %1226 = vsyncadd [#allocation4], 4294967280 }
 0x1cc   :  { %1227 = dma.done.wait [#allocation6], 32  }
 0x1cd   :  { %1228 = vsyncadd [#allocation6], 4294967264 }
 0x1ce   :  { %1229 = dma.done.wait [#allocation9], 32  }
 0x1cf   :  { %1230 = vsyncadd [#allocation9], 4294967264 }
 0x1d0   :  { %1231 = dma.done.wait [#allocation12], 16  }
 0x1d1   :  { %1232 = vsyncadd [#allocation12], 4294967280 }
 0x1d2   :  { %968 = vsyncpa [#allocation4], 1 }
 0x1d3   :  { %969 = vsyncpa [#allocation6], 1 }
 0x1d4   :  { %970 = vsyncpa [#allocation9], 1 }
 0x1d5   :  { %971 = vsyncpa [#allocation12], 1 }

</bundles_post_ra>
